<compile_context>
chip_gen: v7x
topology: tpu7x:2x2x1
jax: 0.10.0
libtpu: 0.0.40
codegen_flags: <defaults>
</compile_context>

<pallas_src>
import jax
import jax.numpy as jnp
from jax.experimental import pallas as pl
from jax.experimental.pallas import tpu as pltpu


# ----------------------------------------------------------------------------
# Fused DeepPoly forward kernel
#   rows of the stacked state S: row 0 = lower bound, row 1 = upper bound
# ----------------------------------------------------------------------------
def _swap_rows(s):
    # (2, K) -> rows swapped ([u; l]).  Tiny static sublane shuffle; keeps the
    # stacked formulation at 2 MXU pushes per affine layer.
    return jnp.concatenate([s[1:2, :], s[0:1, :]], axis=0)


def _affine_interval(s, wp, wn, b):
    # S rows = [l, u].  Result rows = [l@Wp + u@Wn (+b), u@Wp + l@Wn (+b)].
    out = (jnp.dot(s, wp, preferred_element_type=jnp.float32)
           + jnp.dot(_swap_rows(s), wn, preferred_element_type=jnp.float32))
    if b is not None:
        out = out + b
    return out


def _deeppoly_fused_kernel(scalars_ref, x_ref,
                           w1p_ref, w1n_ref, b1_ref,
                           w2p_ref, w2n_ref, b2_ref,
                           vp_ref, vn_ref,
                           lo_ref, hi_ref):
    eps = scalars_ref[0]
    mean = scalars_ref[1]
    inv_std = scalars_ref[2]

    # Infinity-norm layer + normalization layer (fused, elementwise).
    x = x_ref[...]                                          # (1, IN)
    lo = (jnp.clip(x - eps, 0.0, 1.0) - mean) * inv_std
    hi = (jnp.clip(x + eps, 0.0, 1.0) - mean) * inv_std

    s = jnp.concatenate([lo, hi], axis=0)                   # (2, IN) = [l; u]

    # Linear(IN -> H)
    s = _affine_interval(s, w1p_ref[...], w1n_ref[...], b1_ref[...])
    # ReLU (monotone -> apply to both bound rows)
    s = jnp.maximum(s, 0.0)
    # Linear(H -> C)
    s = _affine_interval(s, w2p_ref[...], w2n_ref[...], b2_ref[...])
    # Final verification layer (logit[true] - logit[j], zero bias),
    # kept as its own interval step -- NOT folded into Linear2.
    s = _affine_interval(s, vp_ref[...], vn_ref[...], None)

    lo_ref[...] = s[0:1, :]
    hi_ref[...] = s[1:2, :]


# ----------------------------------------------------------------------------
# Wrapper: precompute static Wp/Wn once, launch a single fused pallas_call
# ----------------------------------------------------------------------------
def prepare_params(params):
    """Hoist the positive/negative weight split out of the kernel (static)."""
    w1, w2, v = params["w1"], params["w2"], params["verif_w"]
    return {
        "w1p": jnp.maximum(w1, 0.0), "w1n": jnp.minimum(w1, 0.0),
        "b1": params["b1"].reshape(1, -1),
        "w2p": jnp.maximum(w2, 0.0), "w2n": jnp.minimum(w2, 0.0),
        "b2": params["b2"].reshape(1, -1),
        "vp": jnp.maximum(v, 0.0), "vn": jnp.minimum(v, 0.0),
    }


def deeppoly_forward(x_nchw, prep, eps, mean, std):
    # flatten NCHW -> (1, N)   (glue; matches .flatten().reshape(1, -1))
    x_flat = x_nchw.reshape(1, -1).astype(jnp.float32)
    # runtime scalars go through SMEM -> changing eps does not recompile
    scalars = jnp.array([eps, mean, 1.0 / std], jnp.float32)

    in_f = x_flat.shape[1]
    h = prep["w1p"].shape[1]
    c = prep["w2p"].shape[1]
    m = prep["vp"].shape[1]                 # num_classes - 1

    def vspec(shape):
        return pl.BlockSpec(shape, lambda: (0,) * len(shape))

    out = jax.ShapeDtypeStruct((1, m), jnp.float32)
    return pl.pallas_call(
        _deeppoly_fused_kernel,
        out_shape=(out, out),
        in_specs=[
            pl.BlockSpec(memory_space=pltpu.MemorySpace.SMEM),   # eps/mean/inv_std
            vspec((1, in_f)),
            vspec((in_f, h)), vspec((in_f, h)), vspec((1, h)),
            vspec((h, c)), vspec((h, c)), vspec((1, c)),
            vspec((c, m)), vspec((c, m)),
        ],
        out_specs=(vspec((1, m)), vspec((1, m))),
    )(scalars, x_flat,
      prep["w1p"], prep["w1n"], prep["b1"],
      prep["w2p"], prep["w2n"], prep["b2"],
      prep["vp"], prep["vn"])


# ----------------------------------------------------------------------------
# Pure-JAX reference (for correctness check) and parameter construction
# ----------------------------------------------------------------------------
def deeppoly_reference(x_nchw, params, eps):
    x = x_nchw.reshape(1, -1).astype(jnp.float32)
    mean, std = params["norm_mean"], params["norm_std"]
    lo = (jnp.clip(x - eps, 0.0, 1.0) - mean) / std
    hi = (jnp.clip(x + eps, 0.0, 1.0) - mean) / std

    def affine(l, u, w, b):
        wp, wn = jnp.maximum(w, 0.0), jnp.minimum(w, 0.0)
        return l @ wp + u @ wn + b, u @ wp + l @ wn + b

    lo, hi = affine(lo, hi, params["w1"], params["b1"])
    lo, hi = jnp.maximum(lo, 0.0), jnp.maximum(hi, 0.0)
    lo, hi = affine(lo, hi, params["w2"], params["b2"])
    lo, hi = affine(lo, hi, params["verif_w"], 0.0)
    return lo, hi


def build_params(key, in_features, hidden, num_classes, true_label):
    k1, k2, k3, k4 = jax.random.split(key, 4)
    w1 = jax.random.normal(k1, (in_features, hidden), jnp.float32) * 0.1
    b1 = jax.random.normal(k2, (hidden,), jnp.float32) * 0.1
    w2 = jax.random.normal(k3, (hidden, num_classes), jnp.float32) * 0.1
    b2 = jax.random.normal(k4, (num_classes,), jnp.float32) * 0.1

    # verification weight: column j corresponds to (true_label - other_j)
    others = [c for c in range(num_classes) if c != true_label]
    verif_w = jnp.zeros((num_classes, num_classes - 1), jnp.float32)
    for col, j in enumerate(others):
        verif_w = verif_w.at[true_label, col].set(1.0)
        verif_w = verif_w.at[j, col].set(-1.0)

    return {
        "w1": w1, "b1": b1,
        "w2": w2, "b2": b2,
        "verif_w": verif_w,
        "norm_mean": 0.1307,   # MNIST-style normalization constants
        "norm_std": 0.3081,
    }


if __name__ == "__main__":
    key = jax.random.PRNGKey(0)
    kx, kp = jax.random.split(key)

    # small MNIST-like input: NCHW (1, 1, 8, 8) -> 64 flattened features
    x = jax.random.uniform(kx, (1, 1, 8, 8), jnp.float32)

    eps = 0.05
    true_label = 3
    num_classes = 10
    in_features = 1 * 8 * 8
    hidden = 32

    params = build_params(kp, in_features, hidden, num_classes, true_label)
    prep = prepare_params(params)

    lower, upper = deeppoly_forward(
        x, prep, eps, params["norm_mean"], params["norm_std"])
    lower = jax.block_until_ready(lower)
    upper = jax.block_until_ready(upper)

    # correctness vs. pure-JAX reference
    ref_lo, ref_hi = deeppoly_reference(x, params, eps)

    assert lower.shape == (1, num_classes - 1)
    assert upper.shape == (1, num_classes - 1)
    assert bool(jnp.all(lower <= upper + 1e-5))
    assert bool(jnp.allclose(lower, ref_lo, atol=1e-4, rtol=1e-4))
    assert bool(jnp.allclose(upper, ref_hi, atol=1e-4, rtol=1e-4))

    print("KERNEL_OK")
</pallas_src>

<mosaic_0001>
module attributes {stable_mosaic.version = 11 : i64} {
  func.func @_deeppoly_fused_kernel(%arg0: memref<3xf32, #tpu.memory_space<smem>>, %arg1: memref<1x64xf32, #tpu.memory_space<vmem>>, %arg2: memref<64x32xf32, #tpu.memory_space<vmem>>, %arg3: memref<64x32xf32, #tpu.memory_space<vmem>>, %arg4: memref<1x32xf32, #tpu.memory_space<vmem>>, %arg5: memref<32x10xf32, #tpu.memory_space<vmem>>, %arg6: memref<32x10xf32, #tpu.memory_space<vmem>>, %arg7: memref<1x10xf32, #tpu.memory_space<vmem>>, %arg8: memref<10x9xf32, #tpu.memory_space<vmem>>, %arg9: memref<10x9xf32, #tpu.memory_space<vmem>>, %arg10: memref<1x9xf32, #tpu.memory_space<vmem>>, %arg11: memref<1x9xf32, #tpu.memory_space<vmem>>) attributes {dimension_semantics = [], scalar_prefetch = 0 : i64, scratch_operands = 0 : i64, tpu.core_type = #tpu.core_type<tc>} {
    %c0 = arith.constant 0 : index
    %0 = memref.load %arg0[%c0] : memref<3xf32, #tpu.memory_space<smem>>
    %c1 = arith.constant 1 : index
    %1 = memref.load %arg0[%c1] : memref<3xf32, #tpu.memory_space<smem>>
    %c2 = arith.constant 2 : index
    %2 = memref.load %arg0[%c2] : memref<3xf32, #tpu.memory_space<smem>>
    %c0_0 = arith.constant 0 : index
    %c0_1 = arith.constant 0 : index
    %3 = vector.load %arg1[%c0_0, %c0_1] : memref<1x64xf32, #tpu.memory_space<vmem>>, vector<1x64xf32>
    %4 = vector.broadcast %0 : f32 to vector<1x64xf32>
    %5 = arith.subf %3, %4 : vector<1x64xf32>
    %cst = arith.constant 0.000000e+00 : f32
    %cst_2 = arith.constant 1.000000e+00 : f32
    %6 = vector.broadcast %cst : f32 to vector<1x64xf32>
    %7 = arith.maximumf %6, %5 : vector<1x64xf32>
    %8 = vector.broadcast %cst_2 : f32 to vector<1x64xf32>
    %9 = arith.minimumf %8, %7 : vector<1x64xf32>
    %10 = vector.broadcast %1 : f32 to vector<1x64xf32>
    %11 = arith.subf %9, %10 : vector<1x64xf32>
    %12 = vector.broadcast %2 : f32 to vector<1x64xf32>
    %13 = arith.mulf %11, %12 : vector<1x64xf32>
    %14 = vector.broadcast %0 : f32 to vector<1x64xf32>
    %15 = arith.addf %3, %14 : vector<1x64xf32>
    %cst_3 = arith.constant 0.000000e+00 : f32
    %cst_4 = arith.constant 1.000000e+00 : f32
    %16 = vector.broadcast %cst_3 : f32 to vector<1x64xf32>
    %17 = arith.maximumf %16, %15 : vector<1x64xf32>
    %18 = vector.broadcast %cst_4 : f32 to vector<1x64xf32>
    %19 = arith.minimumf %18, %17 : vector<1x64xf32>
    %20 = vector.broadcast %1 : f32 to vector<1x64xf32>
    %21 = arith.subf %19, %20 : vector<1x64xf32>
    %22 = vector.broadcast %2 : f32 to vector<1x64xf32>
    %23 = arith.mulf %21, %22 : vector<1x64xf32>
    %24 = tpu.concatenate %13, %23 in 0 : vector<1x64xf32>, vector<1x64xf32> -> vector<2x64xf32>
    %c0_5 = arith.constant 0 : index
    %c0_6 = arith.constant 0 : index
    %25 = vector.load %arg2[%c0_5, %c0_6] : memref<64x32xf32, #tpu.memory_space<vmem>>, vector<64x32xf32>
    %c0_7 = arith.constant 0 : index
    %c0_8 = arith.constant 0 : index
    %26 = vector.load %arg3[%c0_7, %c0_8] : memref<64x32xf32, #tpu.memory_space<vmem>>, vector<64x32xf32>
    %c0_9 = arith.constant 0 : index
    %c0_10 = arith.constant 0 : index
    %27 = vector.load %arg4[%c0_9, %c0_10] : memref<1x32xf32, #tpu.memory_space<vmem>>, vector<1x32xf32>
    %cst_11 = arith.constant dense<0.000000e+00> : vector<2x32xf32>
    %28 = tpu.matmul %24, %25, %cst_11 {dimension_numbers = #tpu.dot_dimension_numbers<[1], [0], [0], [1], [0, 0, 1, 1], [], []>} : vector<2x64xf32>, vector<64x32xf32>, vector<2x32xf32> -> vector<2x32xf32>
    %29 = vector.extract_strided_slice %24 {offsets = [1, 0], sizes = [1, 64], strides = [1, 1]} : vector<2x64xf32> to vector<1x64xf32>
    %30 = vector.extract_strided_slice %24 {offsets = [0, 0], sizes = [1, 64], strides = [1, 1]} : vector<2x64xf32> to vector<1x64xf32>
    %31 = tpu.concatenate %29, %30 in 0 : vector<1x64xf32>, vector<1x64xf32> -> vector<2x64xf32>
    %cst_12 = arith.constant dense<0.000000e+00> : vector<2x32xf32>
    %32 = tpu.matmul %31, %26, %cst_12 {dimension_numbers = #tpu.dot_dimension_numbers<[1], [0], [0], [1], [0, 0, 1, 1], [], []>} : vector<2x64xf32>, vector<64x32xf32>, vector<2x32xf32> -> vector<2x32xf32>
    %33 = arith.addf %28, %32 : vector<2x32xf32>
    %34 = vector.broadcast %27 : vector<1x32xf32> to vector<2x32xf32>
    %35 = arith.addf %33, %34 : vector<2x32xf32>
    %cst_13 = arith.constant 0.000000e+00 : f32
    %36 = vector.broadcast %cst_13 : f32 to vector<2x32xf32>
    %37 = arith.maximumf %35, %36 : vector<2x32xf32>
    %c0_14 = arith.constant 0 : index
    %c0_15 = arith.constant 0 : index
    %38 = vector.load %arg5[%c0_14, %c0_15] : memref<32x10xf32, #tpu.memory_space<vmem>>, vector<32x10xf32>
    %c0_16 = arith.constant 0 : index
    %c0_17 = arith.constant 0 : index
    %39 = vector.load %arg6[%c0_16, %c0_17] : memref<32x10xf32, #tpu.memory_space<vmem>>, vector<32x10xf32>
    %c0_18 = arith.constant 0 : index
    %c0_19 = arith.constant 0 : index
    %40 = vector.load %arg7[%c0_18, %c0_19] : memref<1x10xf32, #tpu.memory_space<vmem>>, vector<1x10xf32>
    %cst_20 = arith.constant dense<0.000000e+00> : vector<2x10xf32>
    %41 = tpu.matmul %37, %38, %cst_20 {dimension_numbers = #tpu.dot_dimension_numbers<[1], [0], [0], [1], [0, 0, 1, 1], [], []>} : vector<2x32xf32>, vector<32x10xf32>, vector<2x10xf32> -> vector<2x10xf32>
    %42 = vector.extract_strided_slice %37 {offsets = [1, 0], sizes = [1, 32], strides = [1, 1]} : vector<2x32xf32> to vector<1x32xf32>
    %43 = vector.extract_strided_slice %37 {offsets = [0, 0], sizes = [1, 32], strides = [1, 1]} : vector<2x32xf32> to vector<1x32xf32>
    %44 = tpu.concatenate %42, %43 in 0 : vector<1x32xf32>, vector<1x32xf32> -> vector<2x32xf32>
    %cst_21 = arith.constant dense<0.000000e+00> : vector<2x10xf32>
    %45 = tpu.matmul %44, %39, %cst_21 {dimension_numbers = #tpu.dot_dimension_numbers<[1], [0], [0], [1], [0, 0, 1, 1], [], []>} : vector<2x32xf32>, vector<32x10xf32>, vector<2x10xf32> -> vector<2x10xf32>
    %46 = arith.addf %41, %45 : vector<2x10xf32>
    %47 = vector.broadcast %40 : vector<1x10xf32> to vector<2x10xf32>
    %48 = arith.addf %46, %47 : vector<2x10xf32>
    %c0_22 = arith.constant 0 : index
    %c0_23 = arith.constant 0 : index
    %49 = vector.load %arg8[%c0_22, %c0_23] : memref<10x9xf32, #tpu.memory_space<vmem>>, vector<10x9xf32>
    %c0_24 = arith.constant 0 : index
    %c0_25 = arith.constant 0 : index
    %50 = vector.load %arg9[%c0_24, %c0_25] : memref<10x9xf32, #tpu.memory_space<vmem>>, vector<10x9xf32>
    %cst_26 = arith.constant dense<0.000000e+00> : vector<2x9xf32>
    %51 = tpu.matmul %48, %49, %cst_26 {dimension_numbers = #tpu.dot_dimension_numbers<[1], [0], [0], [1], [0, 0, 1, 1], [], []>} : vector<2x10xf32>, vector<10x9xf32>, vector<2x9xf32> -> vector<2x9xf32>
    %52 = vector.extract_strided_slice %48 {offsets = [1, 0], sizes = [1, 10], strides = [1, 1]} : vector<2x10xf32> to vector<1x10xf32>
    %53 = vector.extract_strided_slice %48 {offsets = [0, 0], sizes = [1, 10], strides = [1, 1]} : vector<2x10xf32> to vector<1x10xf32>
    %54 = tpu.concatenate %52, %53 in 0 : vector<1x10xf32>, vector<1x10xf32> -> vector<2x10xf32>
    %cst_27 = arith.constant dense<0.000000e+00> : vector<2x9xf32>
    %55 = tpu.matmul %54, %50, %cst_27 {dimension_numbers = #tpu.dot_dimension_numbers<[1], [0], [0], [1], [0, 0, 1, 1], [], []>} : vector<2x10xf32>, vector<10x9xf32>, vector<2x9xf32> -> vector<2x9xf32>
    %56 = arith.addf %51, %55 : vector<2x9xf32>
    %57 = vector.extract_strided_slice %56 {offsets = [0, 0], sizes = [1, 9], strides = [1, 1]} : vector<2x9xf32> to vector<1x9xf32>
    %c0_28 = arith.constant 0 : index
    %c0_29 = arith.constant 0 : index
    %58 = vector.load %arg10[%c0_28, %c0_29] : memref<1x9xf32, #tpu.memory_space<vmem>>, vector<1x9xf32>
    tpu.vector_store %arg10[%c0_28, %c0_29], %57 {strides = array<i32>} : memref<1x9xf32, #tpu.memory_space<vmem>>, vector<1x9xf32>,
    %59 = vector.extract_strided_slice %56 {offsets = [1, 0], sizes = [1, 9], strides = [1, 1]} : vector<2x9xf32> to vector<1x9xf32>
    %c0_30 = arith.constant 0 : index
    %c0_31 = arith.constant 0 : index
    %60 = vector.load %arg11[%c0_30, %c0_31] : memref<1x9xf32, #tpu.memory_space<vmem>>, vector<1x9xf32>
    tpu.vector_store %arg11[%c0_30, %c0_31], %59 {strides = array<i32>} : memref<1x9xf32, #tpu.memory_space<vmem>>, vector<1x9xf32>,
    return
  }
}

</mosaic_0001>

<bundles_post_ra>
// kernel: tpu_custom_call.1
= control target key start
LH: loop header
LB: loop body
LE: loop exit
PB: predicated region body
PF: predicated region fallthrough
CT: control target
= control target key end

     0   :  { %17 = vsyncpa [#allocation4], 0  ;;  %s1086_s0 = inlined_call_operand.vmem [shape: f32[3], index: 0, kind: input, shape index: {}]   ;;  %s1087_s1 = inlined_call_operand.vmem [shape: f32[1,64], index: 1, kind: input, shape index: {}]   ;;  %s1088_s2 = inlined_call_operand.vmem [shape: f32[64,32], index: 2, kind: input, shape index: {}]   ;;  %s1089_s3 = inlined_call_operand.vmem [shape: f32[64,32], index: 3, kind: input, shape index: {}]   ;;  %s1090_s4 = inlined_call_operand.vmem [shape: f32[1,32], index: 4, kind: input, shape index: {}]   ;;  %s1091_s5 = inlined_call_operand.vmem [shape: f32[32,10], index: 5, kind: input, shape index: {}]   ;;  %s1092_s6 = inlined_call_operand.vmem [shape: f32[32,10], index: 6, kind: input, shape index: {}]   ;;  %s1093_s7 = inlined_call_operand.vmem [shape: f32[1,10], index: 7, kind: input, shape index: {}]   ;;  %s1094_s8 = inlined_call_operand.vmem [shape: f32[10,9], index: 8, kind: input, shape index: {}]   ;;  %s1095_s9 = inlined_call_operand.vmem [shape: f32[10,9], index: 9, kind: input, shape index: {}]   ;;  %s1096_s10 = inlined_call_operand.hbm [shape: f32[1,9], index: 10, kind: output, shape index: {0}]   ;;  %s1097_s11 = inlined_call_operand.hbm [shape: f32[1,9], index: 11, kind: output, shape index: {1}]  }
   0x1   :  { %18 = vsyncpa [#allocation3], 0 }
   0x2   :  { %19 = vsyncpa [#allocation7], 0  ;;  %s26_s19 = sshll.u32 %s1086_s0, 4  ;;  %s27_s19 = int_to_ptr.vmem [resolvable:$true] %s26_s19 }
   0x3   :  { %s790_s20 = scalar_lea.vmem %s27_s19, 16  ;;  %p795_p1 = scmp.lt.s32.totalorder %s27_s19, %s27_s19 }
   0x4   :  { %p791_p0 = scmp.ne.s32.totalorder %s27_s19, %s790_s20  ;;  %p796_p2 = scmp.lt.s32.totalorder %s790_s20, %s790_s20 }
   0x6   :  { %p797_p3 = por %p796_p2, %p795_p1 }
   0x8   :  { %p798_p4 = pnand %p797_p3, %p791_p0 }
   0xa   :  { %801 = shalt.err (!%p798_p4)
}
   0xb   :  { %s852_s21 = smov [#allocation2]  }
   0xc   :  { %29 = dma.vmem_to_smem %s27_s19, 16, %s852_s21, [#allocation4]  }
   0xd   :  { %846 = dma.done.wait [#allocation4], 16  }
   0xe   :  { %847 = vsyncadd [#allocation4], 4294967280 }
   0xf   :  { %51 = sfence }
  0x10   :  { %v77_v0 = vld [vmem:[%s1088_s2] sm:$0xff]  ;;  %v78_v1 = vld [vmem:[%s1088_s2 + $0x8] sm:$0xff]  ;;  %v853_v3 = vmov 0.0|0.0   ;;  %v79_v6 = vld [vmem:[%s1088_s2 + $0x10] sm:$0xff]  ;;  %s942_s14 = sld [smem:[#allocation2]]  ;;  %vm854_vm0 = vmmov 0   ;;  %v70_v19 = vlaneseq }
  0x11   :  { %v85_v2 = vld [vmem:[%s1089_s3] sm:$0xff]  ;;  %750 = vmatprep.subr.bf16.mxu1 %v853_v3  ;;  %738 = vmatprep.subr.bf16.mxu0 %v853_v3  ;;  %v751_v4 = vpack.c.bf16 %v78_v1, %v77_v0  ;;  %v86_v5 = vld [vmem:[%s1089_s3 + $0x8] sm:$0xff]  ;;  %v80_v7 = vld [vmem:[%s1088_s2 + $0x18] sm:$0xff]  ;;  %v855_v11 = vmov 0.0   ;;  %s954_s19 = sld [smem:[#allocation2 + $0x1]]  ;;  %s970_s27 = sld [smem:[#allocation2 + $0x2]] }
  0x12   :  { %v739_v8 = vpack.c.bf16 %v86_v5, %v85_v2  ;;  %v87_v9 = vld [vmem:[%s1089_s3 + $0x10] sm:$0xff]  ;;  %v88_v10 = vld [vmem:[%s1089_s3 + $0x18] sm:$0xff]  ;;  %699 = vmatprep.mubr.msk.f32.mxu1 %vm854_vm0, %v855_v11  ;;  %680 = vmatprep.mubr.msk.f32.mxu0 %vm854_vm0, %v855_v11  ;;  %v754_v12 = vpack.c.bf16 %v80_v7, %v79_v6  ;;  %v81_v14 = vld [vmem:[%s1088_s2 + $0x20] sm:$0xff]  ;;  %v71_v31 = vshrl.u32 %v70_v19, 7  ;;  %vm75_vm1 = vcmask 1040384   ;;  %s858_s18 = smov [#allocation6]  }
  0x13   :  { %752 = vmatpush3.bf16.msra.mxu1 %v751_v4  ;;  %v742_v13 = vpack.c.bf16 %v88_v10, %v87_v9  ;;  %v82_v15 = vld [vmem:[%s1088_s2 + $0x28] sm:$0xff]  ;;  %v89_v16 = vld [vmem:[%s1089_s3 + $0x20] sm:$0xff]  ;;  %v83_v23 = vld [vmem:[%s1088_s2 + $0x30] sm:$0xff]  ;;  %vm100_vm2 = vcmask 523264   ;;  %vm269_vm3 = vcmask 261120   ;;  %vm436_vm4 = vcmask 1041408  }
  0x14   :  { %740 = vmatpush3.bf16.msra.mxu0 %v739_v8  ;;  %753 = vmatprep.subr.bf16.mxu1 %v853_v3  ;;  %v90_v17 = vld [vmem:[%s1089_s3 + $0x28] sm:$0xff]  ;;  %v55_v18 = vld [vmem:[%s1087_s1] sm:$0x1]  ;;  %v757_v20 = vpack.c.bf16 %v82_v15, %v81_v14  ;;  %v84_v24 = vld [vmem:[%s1088_s2 + $0x38] sm:$0xff]  ;;  %v72_v40 = vsub.s32 0, %v71_v31  ;;  %vm856_vm5 = vmmov 1  }
  0x15   :  { %741 = vmatprep.subr.bf16.mxu0 %v853_v3  ;;  %v745_v22 = vpack.c.bf16 %v90_v17, %v89_v16  ;;  %v91_v27 = vld [vmem:[%s1089_s3 + $0x30] sm:$0xff]  ;;  %v92_v28 = vld [vmem:[%s1089_s3 + $0x38] sm:$0xff]  ;;  %v760_v32 = vpack.c.bf16 %v84_v24, %v83_v23  ;;  %v254_v48 = vld [vmem:[%s1091_s5] sm:$0xff]  ;;  %vm432_vm7 = vcmask 80896   ;;  %vm585_vm8 = vcmask 65536  }
  0x16   :  { %v56_v21 = vstv %s942_s14  ;;  %v748_v34 = vpack.c.bf16 %v92_v28, %v91_v27  ;;  %v255_v49 = vld [vmem:[%s1091_s5 + $0x8] sm:$0xff]  ;;  %v258_v51 = vld [vmem:[%s1092_s6] sm:$0xff]  ;;  %v256_v54 = vld [vmem:[%s1091_s5 + $0x10] sm:$0xff]  ;;  %vm587_vm9 = vcmask 66561  }
  0x17   :  { %755 = vmatpush3.bf16.msra.mxu1 %v754_v12  ;;  %v57_v25 = vsub.f32 %v55_v18, %v56_v21  ;;  %v64_v26 = vadd.f32 %v56_v21, %v55_v18  ;;  %v60_v33 = vstv %s954_s19  ;;  %v62_v37 = vstv %s970_s27  ;;  %v259_v52 = vld [vmem:[%s1092_s6 + $0x8] sm:$0xff]  ;;  %v257_v55 = vld [vmem:[%s1091_s5 + $0x18] sm:$0xff]  ;;  %vm776_vm6 = vmpackc.low %vm436_vm4, %vm856_vm5  ;;  %s605_s19 = sshll.u32 %s858_s18, 4  ;;  %s1054_s19 = int_to_ptr.vmem [resolvable:$true] %s605_s19 }
  0x18   :  { %743 = vmatpush3.bf16.msra.mxu0 %v742_v13  ;;  %756 = vmatprep.subr.bf16.mxu1 %v853_v3  ;;  %v769_v50 = vpack.c.bf16 %v255_v49, %v254_v48  ;;  %v763_v53 = vpack.c.bf16 %v259_v52, %v258_v51  ;;  %v772_v56 = vpack.c.bf16 %v257_v55, %v256_v54  ;;  %v260_v57 = vld [vmem:[%s1092_s6 + $0x10] sm:$0xff]  ;;  %v261_v58 = vld [vmem:[%s1092_s6 + $0x18] sm:$0xff]  ;;  %v622_v62 = vld [vmem:[%s1090_s4] ss:$0 sm:$0xff] }
  0x19   :  { %744 = vmatprep.subr.bf16.mxu0 %v853_v3  ;;  %v58_v29 = vmax.f32 %v57_v25, 0.0  ;;  %v65_v30 = vmax.f32 %v64_v26, 0.0  ;;  %v766_v59 = vpack.c.bf16 %v261_v58, %v260_v57  ;;  %v422_v7 = vld [vmem:[%s1094_s8] sm:$0xff]  ;;  %v423_v8 = vld [vmem:[%s1094_s8 + $0x8] sm:$0x3]  ;;  %s857_s8 = smov [#allocation5]  }
  0x1a   :  { %v779_v9 = vpack.c.bf16 %v423_v8, %v422_v7  ;;  %v424_v10 = vld [vmem:[%s1095_s9] sm:$0xff] }
  0x1b   :  { %758 = vmatpush3.bf16.msra.mxu1 %v757_v20  ;;  %v59_v35 = vmin.f32 %v58_v29, 1.0  ;;  %v66_v36 = vmin.f32 %v65_v30, 1.0  ;;  %v625_v15 = vld [vmem:[%s1093_s7] ss:$0 sm:$0xff] }
  0x1c   :  { %746 = vmatpush3.bf16.msra.mxu0 %v745_v22  ;;  %759 = vmatprep.subr.bf16.mxu1 %v853_v3 }
  0x1d   :  { %747 = vmatprep.subr.bf16.mxu0 %v853_v3  ;;  %v61_v38 = vsub.f32 %v59_v35, %v60_v33  ;;  %v67_v39 = vsub.f32 %v66_v36, %v60_v33 }
  0x1f   :  { %761 = vmatpush3.bf16.msra.mxu1 %v760_v32  ;;  %v63_v41 = vmul.f32 %v62_v37, %v61_v38  ;;  %v68_v42 = vmul.f32 %v67_v39, %v62_v37 }
  0x20   :  { %749 = vmatpush3.bf16.msra.mxu0 %v748_v34  ;;  %768 = vmatprep.subr.bf16.mxu1 %v853_v3 }
  0x21   :  { %762 = vmatprep.subr.bf16.mxu0 %v853_v3  ;;  %v73_v43 = vrot.slane %v68_v42, %v72_v40 }
  0x23   :  { %v76_v44 = vsel %vm75_vm1, %v63_v41, %v73_v43 }
  0x24   :  { %v95_v45 = vrot.slane %v76_v44, 1  ;;  %v97_v46 = vrot.slane %v76_v44, 7  ;;  %700 = vmatmul.mubr.msk.f32.vlgmr.msra.gmra.mrb[0].mxu1 %vm100_vm2, %v76_v44 }
  0x25   :  { %721 = vmatprep.mubr.msk.f32.mxu1 %vm854_vm0, %v855_v11  ;;  %770 = vmatpush3.bf16.msra.mxu1 %v769_v50 }
  0x26   :  { %v99_v47 = vsel %vm75_vm1, %v95_v45, %v97_v46  ;;  %771 = vmatprep.subr.bf16.mxu1 %v853_v3 }
  0x27   :  { %681 = vmatmul.mubr.msk.f32.vlgmr.msra.gmra.mrb[0].mxu0 %vm100_vm2, %v99_v47 }
  0x28   :  { %710 = vmatprep.mubr.msk.f32.mxu0 %vm854_vm0, %v855_v11  ;;  %764 = vmatpush3.bf16.msra.mxu0 %v763_v53 }
  0x29   :  { %773 = vmatpush3.bf16.msra.mxu1 %v772_v56  ;;  %765 = vmatprep.subr.bf16.mxu0 %v853_v3 }
  0x2a   :  { %774 = vmatprep.subr.bf16.mxu1 %v853_v3 }
  0x2c   :  { %767 = vmatpush3.bf16.msra.mxu0 %v766_v59 }
  0x2d   :  { %778 = vmatprep.subr.bf16.mxu0 %v853_v3 }
  0xf7   :  { %v242_v60 = vpop.f32.mrb[0].mxu1 }
  0xf8   :  { %v701_v61 = vpop.f32.mrb[1].mxu1 }
  0xfa   :  { %v170_v63 = vpop.f32.mrb[0].mxu0 }
  0xfb   :  { %v243_v0 = vadd.f32 %v242_v60, %v170_v63  ;;  %v682_v1 = vpop.f32.mrb[1].mxu0 }
  0xfd   :  { %v252_v2 = vadd.f32 %v622_v62, %v243_v0 }
  0xff   :  { %v253_v4 = vmax.f32 %v252_v2, 0.0 }
 0x101   :  { %v264_v5 = vrot.slane %v253_v4, 1  ;;  %v266_v6 = vrot.slane %v253_v4, 7  ;;  %722 = vmatmul.mubr.msk.f32.vlgmr.msra.gmra.mrb[2].mxu1 %vm269_vm3, %v253_v4 }
 0x102   :  { %728 = vmatprep.mubr.msk.f32.mxu1 %vm854_vm0, %v855_v11 }
 0x103   :  { %v268_v3 = vsel %vm75_vm1, %v264_v5, %v266_v6 }
 0x104   :  { %711 = vmatmul.mubr.msk.f32.vlgmr.msra.gmra.mrb[2].mxu0 %vm269_vm3, %v268_v3 }
 0x105   :  { %735 = vmatprep.mubr.msk.f32.mxu0 %vm854_vm0, %v855_v11  ;;  %781 = vmatpush3.bf16.msk.msra.mxu0 %vm776_vm6, %v779_v9  ;;  %v425_v11 = vld [vmem:[%s1095_s9 + $0x8] sm:$0x3]  ;;  %s595_s9 = sshll.u32 %s857_s8, 4  ;;  %s596_s9 = int_to_ptr.vmem [resolvable:$true] %s595_s9 }
 0x106   :  { %v775_v12 = vpack.c.bf16 %v425_v11, %v424_v10  ;;  %s802_s7 = scalar_lea.vmem %s596_s9, 16  ;;  %s806_s20 = scalar_lea.vmem %s596_s9, 32 }
 0x107   :  { %p803_p5 = scmp.ne.s32.totalorder %s596_s9, %s802_s7  ;;  %p807_p6 = scmp.lt.s32.totalorder %s596_s9, %s596_s9 }
 0x108   :  { %777 = vmatpush3.bf16.msk.msra.mxu1 %vm776_vm6, %v775_v12  ;;  %p808_p7 = scmp.lt.s32.totalorder %s806_s20, %s802_s7 }
 0x10a   :  { %p809_p8 = por %p808_p7, %p807_p6 }
 0x10c   :  { %p810_p9 = pnand %p809_p8, %p803_p5 }
 0x1d4   :  { %v411_v13 = vpop.f32.mrb[2].mxu1 }
 0x1d5   :  { %v723_v14 = vpop.f32.mrb[3].mxu1 }
 0x1d7   :  { %v339_v16 = vpop.f32.mrb[2].mxu0 }
 0x1d8   :  { %v412_v17 = vadd.f32 %v411_v13, %v339_v16  ;;  %v712_v18 = vpop.f32.mrb[3].mxu0 }
 0x1da   :  { %v421_v19 = vadd.f32 %v625_v15, %v412_v17 }
 0x1dc   :  { %v427_v20 = vrot.slane %v421_v19, 1  ;;  %v429_v21 = vrot.slane %v421_v19, 7  ;;  %736 = vmatmul.mubr.msk.f32.vlgmr.msra.gmra.mrb[4].mxu0 %vm432_vm7, %v421_v19 }
 0x1de   :  { %v431_v22 = vsel %vm75_vm1, %v427_v20, %v429_v21 }
 0x1df   :  { %729 = vmatmul.mubr.msk.f32.vlgmr.msra.gmra.mrb[4].mxu1 %vm432_vm7, %v431_v22 }
 0x2af   :  { %v581_v23 = vpop.f32.mrb[4].mxu0 }
 0x2b0   :  { %v737_v24 = vpop.f32.mrb[5].mxu0 }
 0x2b2   :  { %v506_v25 = vpop.f32.mrb[4].mxu1 }
 0x2b3   :  { %v582_v26 = vadd.f32 %v581_v23, %v506_v25  ;;  %v730_v27 = vpop.f32.mrb[5].mxu1 }
 0x2b5   :  { %586 = vst.msk [vmem:[#allocation5] sm:$0x1] %vm585_vm8, %v582_v26 }
 0x2b6   :  { %588 = vst.msk [vmem:[#allocation6 - $0x1] sm:$0x2] %vm587_vm9, %v582_v26 }
 0x2b7   :  { %813 = shalt.err (!%p810_p9)
}
 0x2b8   :  { %s814_s23 = scalar_lea.hbm %s1096_s10, 16 }
 0x2b9   :  { %p815_p10 = scmp.ne.s32.totalorder %s1096_s10, %s814_s23  ;;  %p818_p11 = scmp.lt.u32.totalorder %s814_s23, %s1096_s10 }
 0x2bb   :  { %p820_p12 = pnand %p818_p11, %p815_p10 }
 0x2bd   :  { %823 = shalt.err (!%p820_p12)
}
 0x2be   :  { %598 = dma.vmem_to_hbm [thread:$0]  %s596_s9, 16, %s1096_s10, [#allocation3]  }
 0x2bf   :  { %s824_s29 = scalar_lea.vmem %s1054_s19, 16  ;;  %s828_s30 = scalar_lea.vmem %s1054_s19, 32 }
 0x2c0   :  { %p825_p13 = scmp.ne.s32.totalorder %s1054_s19, %s824_s29  ;;  %p829_p0 = scmp.lt.s32.totalorder %s1054_s19, %s1054_s19 }
 0x2c1   :  { %p830_p1 = scmp.lt.s32.totalorder %s828_s30, %s824_s29 }
 0x2c3   :  { %p831_p2 = por %p830_p1, %p829_p0 }
 0x2c5   :  { %p832_p3 = pnand %p831_p2, %p825_p13 }
 0x2c7   :  { %835 = shalt.err (!%p832_p3)
}
 0x2c8   :  { %s836_s6 = scalar_lea.hbm %s1097_s11, 16 }
 0x2c9   :  { %p837_p4 = scmp.ne.s32.totalorder %s1097_s11, %s836_s6  ;;  %p840_p5 = scmp.lt.u32.totalorder %s836_s6, %s1097_s11 }
 0x2cb   :  { %p842_p6 = pnand %p840_p5, %p837_p4 }
 0x2cd   :  { %845 = shalt.err (!%p842_p6)
}
 0x2ce   :  { %608 = dma.vmem_to_hbm [thread:$0]  %s1054_s19, 16, %s1097_s11, [#allocation7]  }
 0x2cf   :  { %848 = dma.done.wait [#allocation3], 16  }
 0x2d0   :  { %849 = vsyncadd [#allocation3], 4294967280 }
 0x2d1   :  { %850 = dma.done.wait [#allocation7], 16  }
 0x2d2   :  { %851 = vsyncadd [#allocation7], 4294967280 }
 0x2d3   :  { %615 = vsyncpa [#allocation3], 1 }
 0x2d4   :  { %616 = vsyncpa [#allocation7], 1 }
 0x2d5   :  { %617 = vsyncpa [#allocation4], 1 }

</bundles_post_ra>
